<compile_context>
chip_gen: v6e
topology: v6e:2x2x1
jax: 0.10.0
libtpu: 0.0.40
codegen_flags: <defaults>
</compile_context>

<pallas_src>
import functools

import jax
import jax.numpy as jnp
from jax.experimental import pallas as pl
from jax.experimental.pallas import tpu as pltpu


def _round_up(x: int, m: int) -> int:
    return ((x + m - 1) // m) * m


@functools.lru_cache(maxsize=1)
def _vmem_capacity_bytes() -> int:
    """Physical VMEM per TensorCore; conservative v7x fallback (64 MiB)."""
    try:
        return int(pltpu.get_tpu_info().vmem_capacity_bytes)
    except Exception:
        return 64 << 20


@functools.lru_cache(maxsize=1)
def _tensorcores_per_device() -> int:
    """Best-effort TensorCore count per device (v7x megacore = 2).

    Defaults to 1 when undetectable, which disables the tn-split heuristic
    (correct and optimal on v5e/v6e; merely conservative on v7x).
    """
    try:
        info = pltpu.get_tpu_info()
        for attr in ("num_cores", "num_tensorcores", "tensorcores_per_chip"):
            v = getattr(info, attr, None)
            if isinstance(v, int) and v > 0:
                return v
    except Exception:
        pass
    try:
        v = getattr(jax.devices()[0], "num_cores", None)
        if isinstance(v, int) and v > 0:
            return v
    except Exception:
        pass
    return 1


def _atp_linear_kernel(x_ref, w_ref, *rest, has_bias, single_k):
    """o = x @ w.T (+ bias), accumulated over the K grid axis (axis 2).

    x_ref:   (tm, tk)  activation tile
    w_ref:   (tn, tk)  weight tile in native PyTorch (out, in) layout
    b_ref:   (8,  tn)  bias slab (only row 0 is read; sublane broadcast)
    o_ref:   (tm, tn)  output tile
    acc_ref: (tm, tn)  f32 accumulator (only when n_k > 1)
    """
    if has_bias:
        b_ref = rest[0]
        rest = rest[1:]
    o_ref = rest[0]

    def _dot():
        # Contract x's K (dim 1) against w's K (dim 1): the MXU consumes the
        # (N, K) weight tile directly, no wrapper-side weight.T HBM pass.
        # TODO(synk): if the lowered MLIR shows a per-tile vxpose of the
        # weight on the critical path in the small-M regime, pre-transpose
        # the cached weight to (K, N) once outside this kernel.
        return jax.lax.dot_general(
            x_ref[...],
            w_ref[...],
            dimension_numbers=(((1,), (1,)), ((), ())),
            preferred_element_type=jnp.float32,
        )

    if single_k:
        acc = _dot()
        if has_bias:
            acc = acc + b_ref[0:1, :]          # sublane broadcast, no tile temp
        o_ref[...] = acc.astype(o_ref.dtype)
        return

    acc_ref = rest[1]
    k = pl.program_id(2)

    @pl.when(k == 0)
    def _():
        acc_ref[...] = jnp.zeros_like(acc_ref)

    acc_ref[...] += _dot()

    @pl.when(k == pl.num_programs(2) - 1)
    def _():
        acc = acc_ref[...]
        if has_bias:
            acc = acc + b_ref[0:1, :]          # sublane broadcast, no tile temp
        o_ref[...] = acc.astype(o_ref.dtype)


def _choose_tile(d, cands):
    """Largest candidate tile with <= ~12.5% padding overhead, else smallest."""
    for t in cands:
        dp = _round_up(d, t)
        if dp - d <= d // 8:
            return dp, t
    t = cands[-1]
    return _round_up(d, t), t


def _pick_tiles(M, N, K, m_align, n_cores):
    """Pick large, MXU-aligned tiles; return padded dims + tile sizes."""
    large = (M >= 1024 and N >= 1024)

    # M (sublane dim): small-M regime -> single M block.
    if M <= 512:
        Mp = _round_up(M, m_align)
        tm = Mp
    else:
        Mp, tm = _choose_tile(M, [1024, 512, 256, 128] if large else [512, 256, 128])

    # N (lane dim): multiples of 128; go to 1024 for large GEMMs.
    if N <= 512:
        Np = _round_up(N, 128)
        tn = Np
    else:
        Np, tn = _choose_tile(N, [1024, 512, 256, 128] if large else [512, 256, 128])

    # K (reduction axis, last in grid).
    if K <= 1024:
        Kp = _round_up(K, 128)
        tk = Kp
    else:
        Kp = _round_up(K, 512)
        tk = 512

    # Megacore: only split tn when the device actually has >= 2 TensorCores
    # and the parallel grid would otherwise not feed both of them. On 1-TC
    # chips (v5e/v6e) splitting just shrinks the MXU tile for no benefit.
    if n_cores >= 2 and (Mp // tm) * (Np // tn) < n_cores and tn % 256 == 0:
        tn //= 2

    return Mp, Np, Kp, tm, tn, tk


@functools.partial(jax.jit, static_argnames=("compute_dtype",))
def atp_linear_forward(x, weight, bias=None, *, compute_dtype=None):
    """ATPLinear.forward (single device): x @ weight.T (+ bias).

    x:      (batch, seq, input_size)
    weight: (output_size, input_size)   -- native PyTorch Parameter layout
    bias:   (output_size,) or None      -- None == skip_bias_add / bias-less
    compute_dtype: e.g. jnp.bfloat16 on v6e/v7x for full-rate MXU & half the
                   weight HBM traffic; accumulation is always f32. Default
                   None keeps the input dtype (matches the f32 reference).
    returns (batch, seq, output_size), dtype of x.
    """
    *lead, K = x.shape
    N, K_w = weight.shape
    assert K == K_w, "input_size mismatch"
    has_bias = bias is not None

    out_dtype = x.dtype
    if compute_dtype is not None:
        # NOTE: for repeated calls, cast & cache the weight in compute_dtype
        # at the caller; casting here re-reads/writes the weight every call.
        x = x.astype(compute_dtype)
        weight = weight.astype(compute_dtype)

    M = 1
    for d in lead:
        M *= d
    x2d = x.reshape(M, K)

    in_itemsize = jnp.dtype(x2d.dtype).itemsize
    out_itemsize = jnp.dtype(out_dtype).itemsize
    m_align = 8 * (4 // in_itemsize)          # f32 -> 8, bf16 -> 16, i8/fp8 -> 32

    n_cores = _tensorcores_per_device()
    Mp, Np, Kp, tm, tn, tk = _pick_tiles(M, N, K, m_align, n_cores)

    # Zero-pad awkward shapes instead of shrinking tiles. Padding is strictly
    # per-operand (zero-width pads are skipped); zeros are inert in the
    # reduction and padded output rows/cols are sliced off afterwards.
    # NOTE: each pad is an extra HBM pass over that operand -- common
    # transformer dims are already aligned and pay nothing.
    if (Mp, Kp) != (M, K):
        x2d = jnp.pad(x2d, ((0, Mp - M), (0, Kp - K)))
    w = weight
    if (Np, Kp) != (N, K):
        w = jnp.pad(w, ((0, Np - N), (0, Kp - K)))

    inputs = [x2d, w]
    if has_bias:
        b = bias.astype(jnp.float32)
        if Np != N:
            b = jnp.pad(b, (0, Np - N))
        b8 = jnp.broadcast_to(b.reshape(1, Np), (8, Np))   # aligned bias slab
        inputs.append(b8)

    grid = (Mp // tm, Np // tn, Kp // tk)
    n_k = grid[2]
    single_k = n_k == 1

    # Deeper weight buffering only where it pays: memory-bound small-M
    # (weight-streaming) regime with a long K loop. In the compute-bound
    # large-tile regime double-buffering already hides the weight DMA.
    stream_weights = (n_k >= 3) and (M <= 512)
    w_spec_kwargs = {"pipeline_mode": pl.Buffered(3)} if stream_weights else {}
    w_bufs = 3 if stream_weights else 2

    # VMEM footprint: buffered x / w / out, f32 accumulator (multi-K only),
    # bias slab. Explicit limit derived from detected physical VMEM
    # (v7x = 64 MiB, v5e/v6e = 128 MiB) with ~8 MiB headroom, capped at
    # 100 MiB so large-tile configs get double-buffering everywhere.
    vmem_bytes = (
        2 * tm * tk * in_itemsize
        + w_bufs * tn * tk * in_itemsize
        + 2 * tm * tn * out_itemsize
        + (0 if single_k else tm * tn * 4)
        + (2 * 8 * tn * 4 if has_bias else 0)
    )
    vmem_cap = min(_vmem_capacity_bytes() - (8 << 20), 100 << 20)
    vmem_limit = int(min(max(int(vmem_bytes * 1.25) + (4 << 20), 16 << 20), vmem_cap))

    in_specs = [
        pl.BlockSpec((tm, tk), lambda i, j, k: (i, k)),                       # x
        pl.BlockSpec((tn, tk), lambda i, j, k: (j, k), **w_spec_kwargs),      # weight (N, K)
    ]
    if has_bias:
        in_specs.append(pl.BlockSpec((8, tn), lambda i, j, k: (0, j)))        # bias slab

    scratch_shapes = [] if single_k else [pltpu.VMEM((tm, tn), jnp.float32)]

    kernel = functools.partial(
        _atp_linear_kernel, has_bias=has_bias, single_k=single_k
    )

    # Advisory cost estimate: count actual padded traffic including per-tile
    # re-reads of x (once per N block) and w (once per M block).
    cost = pl.CostEstimate(
        flops=2 * M * N * K,
        transcendentals=0,
        bytes_accessed=(
            Mp * Kp * (Np // tn) * in_itemsize
            + Np * Kp * (Mp // tm) * in_itemsize
            + (8 * Np * 4 if has_bias else 0)
            + Mp * Np * out_itemsize
        ),
    )

    out2d = pl.pallas_call(
        kernel,
        out_shape=jax.ShapeDtypeStruct((Mp, Np), out_dtype),
        grid_spec=pltpu.PrefetchScalarGridSpec(
            num_scalar_prefetch=0,
            grid=grid,
            in_specs=in_specs,
            out_specs=pl.BlockSpec((tm, tn), lambda i, j, k: (i, j)),
            scratch_shapes=scratch_shapes,
        ),
        compiler_params=pltpu.CompilerParams(
            dimension_semantics=("parallel", "parallel", "arbitrary"),
            vmem_limit_bytes=vmem_limit,
        ),
        cost_estimate=cost,
    )(*inputs)

    out2d = out2d[:M, :N]
    return out2d.reshape(*lead, N)


if __name__ == "__main__":
    # Small shapes consistent with the module: batch=2, seq=8,
    # input_size=128, output_size=256 (single device => shard sizes == full).
    # TODO(synk): mesh collectives (all_reduce / reduce_scatter / gather) are
    # identity at group size 1 and are not modeled here.
    batch, seq = 2, 8
    input_size, output_size = 128, 256

    key = jax.random.PRNGKey(0)
    kx, kw, kb = jax.random.split(key, 3)

    x = jax.random.normal(kx, (batch, seq, input_size), dtype=jnp.float32)
    weight = (
        jax.random.normal(kw, (output_size, input_size), dtype=jnp.float32) * 0.02
    )
    bias = jax.random.normal(kb, (output_size,), dtype=jnp.float32) * 0.01

    out = atp_linear_forward(x, weight, bias)
    out = jax.block_until_ready(out)

    ref = x.reshape(-1, input_size) @ weight.T + bias
    ref = ref.reshape(batch, seq, output_size)
    assert out.shape == ref.shape, "shape mismatch vs reference"
    assert jnp.allclose(out, ref, atol=1e-4, rtol=1e-4), "mismatch vs reference"

    # Also exercise the no-bias (skip_bias_add) path.
    out_nb = jax.block_until_ready(atp_linear_forward(x, weight, None))
    ref_nb = (x.reshape(-1, input_size) @ weight.T).reshape(batch, seq, output_size)
    assert jnp.allclose(out_nb, ref_nb, atol=1e-4, rtol=1e-4), "no-bias mismatch"

    print("KERNEL_OK")
</pallas_src>

<mosaic_0001>
module attributes {stable_mosaic.version = 11 : i64} {
  func.func @_atp_linear_kernel(%arg0: i32, %arg1: i32, %arg2: i32, %arg3: memref<16x128xf32, #tpu.memory_space<vmem>>, %arg4: memref<256x128xf32, #tpu.memory_space<vmem>>, %arg5: memref<8x256xf32, #tpu.memory_space<vmem>>, %arg6: memref<16x256xf32, #tpu.memory_space<vmem>>) attributes {dimension_semantics = [#tpu.dimension_semantics<parallel>, #tpu.dimension_semantics<parallel>, #tpu.dimension_semantics<arbitrary>], iteration_bounds = array<i64: 1, 1, 1>, scalar_prefetch = 0 : i64, scratch_operands = 0 : i64, tpu.core_type = #tpu.core_type<tc>, window_params = [{transform_indices = @transform_0, window_bounds = array<i64: 16, 128>}, {transform_indices = @transform_1, window_bounds = array<i64: 256, 128>}, {transform_indices = @transform_2, window_bounds = array<i64: 8, 256>}, {transform_indices = @transform_3, window_bounds = array<i64: 16, 256>}]} {
    %c0 = arith.constant 0 : index
    %c0_0 = arith.constant 0 : index
    %0 = vector.load %arg3[%c0, %c0_0] : memref<16x128xf32, #tpu.memory_space<vmem>>, vector<16x128xf32>
    %c0_1 = arith.constant 0 : index
    %c0_2 = arith.constant 0 : index
    %1 = vector.load %arg4[%c0_1, %c0_2] : memref<256x128xf32, #tpu.memory_space<vmem>>, vector<256x128xf32>
    %cst = arith.constant dense<0.000000e+00> : vector<16x256xf32>
    %2 = tpu.matmul %0, %1, %cst {dimension_numbers = #tpu.dot_dimension_numbers<[1], [1], [0], [0], [0, 0, 1, 0], [], []>} : vector<16x128xf32>, vector<256x128xf32>, vector<16x256xf32> -> vector<16x256xf32>
    %c0_3 = arith.constant 0 : index
    %c0_4 = arith.constant 0 : index
    %3 = vector.load %arg5[%c0_3, %c0_4] : memref<8x256xf32, #tpu.memory_space<vmem>>, vector<1x256xf32>
    %4 = vector.broadcast %3 : vector<1x256xf32> to vector<16x256xf32>
    %5 = arith.addf %2, %4 : vector<16x256xf32>
    %c0_5 = arith.constant 0 : index
    %c0_6 = arith.constant 0 : index
    %6 = vector.load %arg6[%c0_5, %c0_6] : memref<16x256xf32, #tpu.memory_space<vmem>>, vector<16x256xf32>
    tpu.vector_store %arg6[%c0_5, %c0_6], %5 {strides = array<i32>} : memref<16x256xf32, #tpu.memory_space<vmem>>, vector<16x256xf32>,
    return
  }
  func.func @transform_0(%arg0: i32, %arg1: i32, %arg2: i32) -> (i32, i32) {
    %c0_i32 = arith.constant 0 : i32
    return %arg0, %arg2 : i32, i32
  }
  func.func @transform_1(%arg0: i32, %arg1: i32, %arg2: i32) -> (i32, i32) {
    %c0_i32 = arith.constant 0 : i32
    return %arg1, %arg2 : i32, i32
  }
  func.func @transform_2(%arg0: i32, %arg1: i32, %arg2: i32) -> (i32, i32) {
    %c0_i32 = arith.constant 0 : i32
    %c0_i32_0 = arith.constant 0 : i32
    return %c0_i32, %arg1 : i32, i32
  }
  func.func @transform_3(%arg0: i32, %arg1: i32, %arg2: i32) -> (i32, i32) {
    %c0_i32 = arith.constant 0 : i32
    return %arg0, %arg1 : i32, i32
  }
}

</mosaic_0001>

<bundles_post_ra>
// kernel: atp_linear_forward.1
= control target key start
LH: loop header
LB: loop body
LE: loop exit
PB: predicated region body
PF: predicated region fallthrough
CT: control target
= control target key end

     0   :  { %8 = vsyncpa [#allocation3], 0  ;;  %s340_s0 = inlined_call_operand.vmem [shape: f32[16,128], index: 0, kind: input, shape index: {}]   ;;  %s341_s1 = inlined_call_operand.hbm [shape: f32[256,128], index: 1, kind: input, shape index: {}]   ;;  %s342_s2 = inlined_call_operand.vmem [shape: f32[8,256], index: 2, kind: input, shape index: {}]   ;;  %s343_s3 = inlined_call_operand.hbm [shape: f32[16,256], index: 3, kind: output, shape index: {}]  }
   0x1   :  { %9 = vsyncpa [#allocation4], 0  ;;  %s291_s12 = smov [#allocation2]  }
   0x2   :  { %s17_s13 = sshll.u32 %s291_s12, 4  ;;  %s18_s13 = int_to_ptr.vmem [resolvable:$true] %s17_s13 }
   0x3   :  { %s255_s14 = scalar_lea.vmem %s18_s13, 4096  ;;  %p260_p1 = scmp.lt.s32.totalorder %s18_s13, %s18_s13 }
   0x4   :  { %p256_p0 = scmp.ne.s32.totalorder %s18_s13, %s255_s14  ;;  %p261_p2 = scmp.lt.s32.totalorder %s255_s14, %s255_s14 }
   0x6   :  { %p262_p3 = por %p261_p2, %p260_p1 }
   0x8   :  { %p263_p4 = pnand %p262_p3, %p256_p0 }
   0xa   :  { %266 = shalt.err (!%p263_p4)
}
   0xb   :  { %s292_s15 = smov 128   ;;  %s293_s16 = smov 8  }
   0xc   :  { %23 = dma.hbm_to_vmem [thread:$0]  %s341_s1, 4096, %s18_s13, [#allocation3], %s292_s15, %s292_s15, %s293_s16  }
   0xd   :  { %287 = dma.done.wait [#allocation3], 4096  }
   0xe   :  { %288 = vsyncadd [#allocation3], 4294963200  ;;  %v62_v0 = vld [vmem:[#allocation2 + $0xf8] sm:$0xff]  ;;  %v61_v2 = vld [vmem:[#allocation2 + $0xf0] sm:$0xff]  ;;  %v65_v34 = vlaneseq  ;;  %s294_s23 = smov [#allocation5]  }
   0xf   :  { %v46_v1 = vld [vmem:[#allocation2 + $0x78] sm:$0xff]  ;;  %173 = vmatprep.subr.mxu0 %v62_v0  ;;  %209 = vmatprep.subr.mxu1 %v62_v0  ;;  %v45_v3 = vld [vmem:[#allocation2 + $0x70] sm:$0xff]  ;;  %v60_v4 = vld [vmem:[#allocation2 + $0xe8] sm:$0xff]  ;;  %s161_s24 = sshll.u32 %s294_s23, 4  ;;  %s162_s24 = int_to_ptr.vmem [resolvable:$true] %s161_s24 }
  0x10   :  { %174 = vmatpush3.xpose.msra.mxu0 %v46_v1  ;;  %225 = vmatpush3.xpose.msra.mxu1 %v46_v1  ;;  %v44_v5 = vld [vmem:[#allocation2 + $0x68] sm:$0xff]  ;;  %v59_v6 = vld [vmem:[#allocation2 + $0xe0] sm:$0xff]  ;;  %v58_v10 = vld [vmem:[#allocation2 + $0xd8] sm:$0xff]  ;;  %v66_v35 = vshrl.u32 %v65_v34, 7  ;;  %s267_s25 = scalar_lea.vmem %s162_s24, 512  ;;  %p272_p6 = scmp.lt.s32.totalorder %s162_s24, %s162_s24 }
  0x11   :  { %175 = vmatprep.subr.mxu0 %v61_v2  ;;  %210 = vmatprep.subr.mxu1 %v61_v2  ;;  %v323_v7 = vld [vmem:[%s340_s0] sm:$0xff]  ;;  %v328_v9 = vld [vmem:[%s340_s0 + $0x8] sm:$0xff]  ;;  %v42_v11 = vld [vmem:[#allocation2 + $0x58] sm:$0xff]  ;;  %p268_p5 = scmp.ne.s32.totalorder %s162_s24, %s267_s25  ;;  %p273_p7 = scmp.lt.s32.totalorder %s267_s25, %s267_s25 }
  0x12   :  { %v43_v8 = vld [vmem:[#allocation2 + $0x60] sm:$0xff]  ;;  %205 = vmatprep.mubr.f32.mxu0 %v323_v7  ;;  %207 = vmatprep.mubr.f32.mxu1 %v328_v9  ;;  %v57_v12 = vld [vmem:[#allocation2 + $0xd0] sm:$0xff]  ;;  %v56_v14 = vld [vmem:[#allocation2 + $0xc8] sm:$0xff]  ;;  %v67_v36 = vsub.s32 0, %v66_v35  ;;  %v71_v38 = vsub.s32 1, %v66_v35 }
  0x13   :  { %v41_v13 = vld [vmem:[#allocation2 + $0x50] sm:$0xff]  ;;  %v40_v15 = vld [vmem:[#allocation2 + $0x48] sm:$0xff]  ;;  %v55_v16 = vld [vmem:[#allocation2 + $0xc0] sm:$0xff]  ;;  %p274_p8 = por %p273_p7, %p272_p6 }
  0x14   :  { %176 = vmatpush3.xpose.msra.mxu0 %v45_v3  ;;  %226 = vmatpush3.xpose.msra.mxu1 %v45_v3  ;;  %v39_v17 = vld [vmem:[#allocation2 + $0x40] sm:$0xff]  ;;  %v54_v18 = vld [vmem:[#allocation2 + $0xb8] sm:$0xff]  ;;  %v53_v20 = vld [vmem:[#allocation2 + $0xb0] sm:$0xff] }
  0x15   :  { %177 = vmatprep.subr.mxu0 %v60_v4  ;;  %211 = vmatprep.subr.mxu1 %v60_v4  ;;  %v38_v19 = vld [vmem:[#allocation2 + $0x38] sm:$0xff]  ;;  %v37_v21 = vld [vmem:[#allocation2 + $0x30] sm:$0xff]  ;;  %v52_v22 = vld [vmem:[#allocation2 + $0xa8] sm:$0xff]  ;;  %p275_p9 = pnand %p274_p8, %p268_p5 }
  0x16   :  { %v36_v23 = vld [vmem:[#allocation2 + $0x28] sm:$0xff]  ;;  %v51_v24 = vld [vmem:[#allocation2 + $0xa0] sm:$0xff]  ;;  %v50_v26 = vld [vmem:[#allocation2 + $0x98] sm:$0xff] }
  0x17   :  { %v35_v25 = vld [vmem:[#allocation2 + $0x20] sm:$0xff]  ;;  %v34_v27 = vld [vmem:[#allocation2 + $0x18] sm:$0xff]  ;;  %v49_v28 = vld [vmem:[#allocation2 + $0x90] sm:$0xff] }
  0x18   :  { %178 = vmatpush3.xpose.msra.mxu0 %v44_v5  ;;  %227 = vmatpush3.xpose.msra.mxu1 %v44_v5  ;;  %v33_v29 = vld [vmem:[#allocation2 + $0x10] sm:$0xff]  ;;  %v48_v30 = vld [vmem:[#allocation2 + $0x88] sm:$0xff]  ;;  %v47_v32 = vld [vmem:[#allocation2 + $0x80] sm:$0xff] }
  0x19   :  { %179 = vmatprep.subr.mxu0 %v59_v6  ;;  %212 = vmatprep.subr.mxu1 %v59_v6  ;;  %v32_v31 = vld [vmem:[#allocation2 + $0x8] sm:$0xff]  ;;  %v31_v33 = vld [vmem:[#allocation2] sm:$0xff] }
  0x1a   :  { %v63_v37 = vld [vmem:[%s342_s2] ss:$8 sm:$0x3] }
  0x1b   :  { %v68_v39 = vrot.slane %v63_v37, %v67_v36  ;;  %v72_v40 = vrot.slane %v63_v37, %v71_v38 }
  0x1c   :  { %180 = vmatpush3.xpose.msra.mxu0 %v43_v8  ;;  %228 = vmatpush3.xpose.msra.mxu1 %v43_v8 }
  0x1d   :  { %181 = vmatprep.subr.mxu0 %v58_v10  ;;  %213 = vmatprep.subr.mxu1 %v58_v10 }
  0x20   :  { %182 = vmatpush3.xpose.msra.mxu0 %v42_v11  ;;  %229 = vmatpush3.xpose.msra.mxu1 %v42_v11 }
  0x21   :  { %183 = vmatprep.subr.mxu0 %v57_v12  ;;  %214 = vmatprep.subr.mxu1 %v57_v12 }
  0x24   :  { %184 = vmatpush3.xpose.msra.mxu0 %v41_v13  ;;  %230 = vmatpush3.xpose.msra.mxu1 %v41_v13 }
  0x25   :  { %185 = vmatprep.subr.mxu0 %v56_v14  ;;  %215 = vmatprep.subr.mxu1 %v56_v14 }
  0x28   :  { %186 = vmatpush3.xpose.msra.mxu0 %v40_v15  ;;  %231 = vmatpush3.xpose.msra.mxu1 %v40_v15 }
  0x29   :  { %187 = vmatprep.subr.mxu0 %v55_v16  ;;  %216 = vmatprep.subr.mxu1 %v55_v16 }
  0x2c   :  { %188 = vmatpush3.xpose.msra.mxu0 %v39_v17  ;;  %232 = vmatpush3.xpose.msra.mxu1 %v39_v17 }
  0x2d   :  { %189 = vmatprep.subr.mxu0 %v54_v18  ;;  %217 = vmatprep.subr.mxu1 %v54_v18 }
  0x30   :  { %190 = vmatpush3.xpose.msra.mxu0 %v38_v19  ;;  %233 = vmatpush3.xpose.msra.mxu1 %v38_v19 }
  0x31   :  { %191 = vmatprep.subr.mxu0 %v53_v20  ;;  %218 = vmatprep.subr.mxu1 %v53_v20 }
  0x34   :  { %192 = vmatpush3.xpose.msra.mxu0 %v37_v21  ;;  %234 = vmatpush3.xpose.msra.mxu1 %v37_v21 }
  0x35   :  { %193 = vmatprep.subr.mxu0 %v52_v22  ;;  %219 = vmatprep.subr.mxu1 %v52_v22 }
  0x38   :  { %194 = vmatpush3.xpose.msra.mxu0 %v36_v23  ;;  %235 = vmatpush3.xpose.msra.mxu1 %v36_v23 }
  0x39   :  { %195 = vmatprep.subr.mxu0 %v51_v24  ;;  %220 = vmatprep.subr.mxu1 %v51_v24 }
  0x3c   :  { %196 = vmatpush3.xpose.msra.mxu0 %v35_v25  ;;  %236 = vmatpush3.xpose.msra.mxu1 %v35_v25 }
  0x3d   :  { %197 = vmatprep.subr.mxu0 %v50_v26  ;;  %221 = vmatprep.subr.mxu1 %v50_v26 }
  0x40   :  { %198 = vmatpush3.xpose.msra.mxu0 %v34_v27  ;;  %237 = vmatpush3.xpose.msra.mxu1 %v34_v27 }
  0x41   :  { %199 = vmatprep.subr.mxu0 %v49_v28  ;;  %222 = vmatprep.subr.mxu1 %v49_v28 }
  0x44   :  { %200 = vmatpush3.xpose.msra.mxu0 %v33_v29  ;;  %238 = vmatpush3.xpose.msra.mxu1 %v33_v29 }
  0x45   :  { %201 = vmatprep.subr.mxu0 %v48_v30  ;;  %223 = vmatprep.subr.mxu1 %v48_v30 }
  0x48   :  { %202 = vmatpush3.xpose.msra.mxu0 %v32_v31  ;;  %239 = vmatpush3.xpose.msra.mxu1 %v32_v31 }
  0x49   :  { %203 = vmatprep.subr.mxu0 %v47_v32  ;;  %224 = vmatprep.subr.mxu1 %v47_v32 }
  0x4c   :  { %204 = vmatpush3.xpose.msra.mxu0 %v31_v33  ;;  %240 = vmatpush3.xpose.msra.mxu1 %v31_v33 }
  0x4f   :  { %206 = vmatmul.mubr.f32.vlgmr.msra.gmra.mxu0 %v323_v7  ;;  %208 = vmatmul.mubr.f32.vlgmr.msra.gmra.mxu1 %v328_v9 }
 0x10f   :  { %v141_v41 = vpop.f32.mrf.mxu0  ;;  %v147_v42 = vpop.f32.mrf.mxu1 }
 0x110   :  { %v142_v43 = vadd.f32 %v141_v41, %v68_v39  ;;  %v148_v44 = vadd.f32 %v147_v42, %v68_v39 }
 0x111   :  { %v143_v45 = vpop.f32.mrf.mxu0  ;;  %v149_v46 = vpop.f32.mrf.mxu1 }
 0x112   :  { %152 = vst [vmem:[#allocation5] sm:$0xff] %v142_v43  ;;  %154 = vst [vmem:[#allocation5 + $0x10] sm:$0xff] %v148_v44  ;;  %v144_v47 = vadd.f32 %v143_v45, %v72_v40  ;;  %v150_v48 = vadd.f32 %v149_v46, %v72_v40 }
 0x114   :  { %153 = vst [vmem:[#allocation5 + $0x8] sm:$0xff] %v144_v47  ;;  %155 = vst [vmem:[#allocation5 + $0x18] sm:$0xff] %v150_v48 }
 0x115   :  { %278 = shalt.err (!%p275_p9)
}
 0x116   :  { %s295_s2 = smov 256   ;;  %s296_s26 = smov 16  }
 0x117   :  { %167 = dma.vmem_to_hbm [thread:$0]  %s162_s24, 512, %s343_s3, [#allocation4], %s295_s2, %s295_s2, %s296_s26  }
 0x118   :  { %289 = dma.done.wait [#allocation4], 512  }
 0x119   :  { %290 = vsyncadd [#allocation4], 4294966784 }
 0x11a   :  { %171 = vsyncpa [#allocation3], 1 }
 0x11b   :  { %172 = vsyncpa [#allocation4], 1 }

</bundles_post_ra>
